<compile_context>
chip_gen: v7x
topology: tpu7x:2x2x1
jax: 0.10.0
libtpu: 0.0.40
codegen_flags: <defaults>
</compile_context>

<pallas_src>
import functools

import jax
import jax.numpy as jnp
from jax import lax
from jax.experimental import pallas as pl
from jax.experimental.pallas import tpu as pltpu


def reconf_flow_kernel(x_ref, w1T_ref, b1_ref, wpT_ref, bp_ref, o_ref):
    """out_row = sum((WpT @ tanh(W1T @ x^T + b1) + bp)**2, sublane axis).

    Layout (batch on the 128-lane axis for every intermediate):
      x_ref  : (TB, D)  row-major tile straight from HBM (no pre-transpose)
      w1T_ref: (H, D)   b1_ref: (H, 1)
      wpT_ref: (S, H)   bp_ref: (S, 1)
      o_ref  : (1, TB)  lane-dense output row (unmasked full-lane stores)
    """
    x = x_ref[...]                                                  # (TB, D)
    # Contract D against D (A @ B^T form): result is (H, TB), batch on lanes.
    hT = jnp.tanh(
        lax.dot_general(w1T_ref[...], x,
                        dimension_numbers=(((1,), (1,)), ((), ())),
                        preferred_element_type=jnp.float32)
        + b1_ref[...]                                               # (H, 1) lane-bcast
    )                                                               # (H, TB)
    perpT = (
        jnp.dot(wpT_ref[...], hT, preferred_element_type=jnp.float32)
        + bp_ref[...]                                               # (S, 1) lane-bcast
    )                                                               # (S, TB)
    # Sublane (XLU) reduce -> lane-dense (1, TB) row.
    o_ref[...] = jnp.sum(perpT * perpT, axis=0, keepdims=True)


def _pick_batch_tile(B, D, H, S, max_tile, vmem_budget_bytes):
    """Largest 128-multiple batch tile fitting a conservative VMEM budget.

    Per batch column (f32): double-buffered x tile (2*D), double-buffered
    output row (2*1), plus hT/perpT intermediates (H + S).  The budget is
    kept well under the smallest scoped-VMEM default (v7x), so no
    vmem_limit_bytes override is needed on any generation.
    """
    per_col_bytes = (2 * D + 2 + H + S) * 4
    tb = (vmem_budget_bytes // per_col_bytes) // 128 * 128
    tb = max(128, min(tb, max_tile))
    tb = min(tb, pl.cdiv(B, 128) * 128)      # never larger than the padded batch
    return tb


@functools.partial(jax.jit, static_argnames=("max_batch_tile",))
def reconf_flow_forward(x, w1, b1, w2, b2, proj_b, NS, *, max_batch_tile=2048):
    """x: (B, D) f32.  Returns proj_error of shape (B,)."""
    B, D = x.shape
    H = w1.shape[1]
    S = NS.shape[1]

    TB = _pick_batch_tile(B, D, H, S, max_batch_tile, vmem_budget_bytes=8 << 20)
    B_pad = pl.cdiv(B, TB) * TB

    # ---- algebraic fusion (batch-independent; folded once under jit) ----
    x32 = jnp.asarray(x, jnp.float32)
    w1T = jnp.asarray(w1, jnp.float32).T                     # (H, D)
    b1c = jnp.asarray(b1, jnp.float32).reshape(H, 1)         # (H, 1)
    NS32 = jnp.asarray(NS, jnp.float32)
    WpT = (jnp.asarray(w2, jnp.float32) @ NS32).T            # (S, H) = (w2 @ NS)^T
    bpc = ((jnp.asarray(b2, jnp.float32) - jnp.asarray(proj_b, jnp.float32))
           @ NS32).reshape(S, 1)                             # (S, 1)

    # Ragged-batch path: zero-pad rows (padded outputs are sliced off below).
    if B_pad != B:
        x32 = jnp.pad(x32, ((0, B_pad - B), (0, 0)))

    out_row = pl.pallas_call(
        reconf_flow_kernel,
        out_shape=jax.ShapeDtypeStruct((1, B_pad), jnp.float32),
        grid_spec=pltpu.PrefetchScalarGridSpec(
            num_scalar_prefetch=0,
            grid=(B_pad // TB,),
            in_specs=[
                pl.BlockSpec((TB, D), lambda i: (i, 0)),     # x, tiled over batch rows
                pl.BlockSpec((H, D), lambda i: (0, 0)),      # w1^T        (grid-invariant)
                pl.BlockSpec((H, 1), lambda i: (0, 0)),      # b1          (grid-invariant)
                pl.BlockSpec((S, H), lambda i: (0, 0)),      # (w2 @ NS)^T (grid-invariant)
                pl.BlockSpec((S, 1), lambda i: (0, 0)),      # (b2-proj_b)@NS
            ],
            out_specs=pl.BlockSpec((1, TB), lambda i: (0, i)),  # lane-dense output row
        ),
        compiler_params=pltpu.CompilerParams(
            dimension_semantics=("parallel",)),
    )(x32, w1T, b1c, WpT, bpc)
    return out_row[0, :B]


def reference_forward(x, w1, b1, w2, b2, proj_b, NS):
    h = jnp.tanh(x @ w1 + b1)
    z = h @ w2 + b2
    perp = (z - proj_b) @ NS
    return (perp ** 2).sum(axis=1)


if __name__ == "__main__":
    # Small deterministic shapes.  B=256 runs as a single TB=256 grid step;
    # a ragged B=200 call below exercises the zero-pad path.
    B, D, H, S = 256, 32, 32, 8
    key = jax.random.PRNGKey(0)
    kx, kw1, kb1, kw2, kb2, kpb, kns = jax.random.split(key, 7)

    x = jax.random.normal(kx, (B, D), dtype=jnp.float32)

    # Deterministic synthetic "net" (2-layer tanh MLP) parameters.
    w1 = 0.1 * jax.random.normal(kw1, (D, H), dtype=jnp.float32)
    b1 = 0.1 * jax.random.normal(kb1, (H,), dtype=jnp.float32)
    w2 = 0.1 * jax.random.normal(kw2, (H, D), dtype=jnp.float32)
    b2 = 0.1 * jax.random.normal(kb2, (D,), dtype=jnp.float32)

    # ReconfFlow buffers: projection center and null-space vectors.
    proj_b = jax.random.normal(kpb, (D,), dtype=jnp.float32)
    NS = jax.random.normal(kns, (D, S), dtype=jnp.float32)
    NS = NS / jnp.linalg.norm(NS, axis=0, keepdims=True)   # column-normalized

    out = reconf_flow_forward(x, w1, b1, w2, b2, proj_b, NS)
    out = jax.block_until_ready(out)
    ref = reference_forward(x, w1, b1, w2, b2, proj_b, NS)
    assert out.shape == (B,)
    # The (w2 @ NS) / (b2 - proj_b) @ NS pre-fusion is exact algebra but
    # reorders f32 accumulation vs. the PyTorch op order, hence 1e-4 tolerance.
    assert jnp.allclose(out, ref, rtol=1e-4, atol=1e-4), (out, ref)

    # Ragged-batch (zero-pad) path.
    xr = x[:200]
    out_r = jax.block_until_ready(
        reconf_flow_forward(xr, w1, b1, w2, b2, proj_b, NS))
    ref_r = reference_forward(xr, w1, b1, w2, b2, proj_b, NS)
    assert out_r.shape == (200,)
    assert jnp.allclose(out_r, ref_r, rtol=1e-4, atol=1e-4)

    # TODO(synk): train_step (autograd + optimizer step) is host-side training
    # logic, not part of the forward kernel.
    print("KERNEL_OK")
</pallas_src>

<mosaic_0001>
module attributes {stable_mosaic.version = 11 : i64} {
  func.func @reconf_flow_kernel(%arg0: i32, %arg1: memref<256x32xf32, #tpu.memory_space<vmem>>, %arg2: memref<32x32xf32, #tpu.memory_space<vmem>>, %arg3: memref<32x1xf32, #tpu.memory_space<vmem>>, %arg4: memref<8x32xf32, #tpu.memory_space<vmem>>, %arg5: memref<8x1xf32, #tpu.memory_space<vmem>>, %arg6: memref<1x256xf32, #tpu.memory_space<vmem>>) attributes {dimension_semantics = [#tpu.dimension_semantics<parallel>], iteration_bounds = array<i64: 1>, scalar_prefetch = 0 : i64, scratch_operands = 0 : i64, tpu.core_type = #tpu.core_type<tc>, window_params = [{transform_indices = @transform_0, window_bounds = array<i64: 256, 32>}, {pipeline_mode = #tpu.pipeline_mode<synchronous>, transform_indices = @transform_1, window_bounds = array<i64: 32, 32>}, {pipeline_mode = #tpu.pipeline_mode<synchronous>, transform_indices = @transform_2, window_bounds = array<i64: 32, 1>}, {pipeline_mode = #tpu.pipeline_mode<synchronous>, transform_indices = @transform_3, window_bounds = array<i64: 8, 32>}, {pipeline_mode = #tpu.pipeline_mode<synchronous>, transform_indices = @transform_4, window_bounds = array<i64: 8, 1>}, {transform_indices = @transform_5, window_bounds = array<i64: 1, 256>}]} {
    %c0 = arith.constant 0 : index
    %c0_0 = arith.constant 0 : index
    %0 = vector.load %arg1[%c0, %c0_0] : memref<256x32xf32, #tpu.memory_space<vmem>>, vector<256x32xf32>
    %c0_1 = arith.constant 0 : index
    %c0_2 = arith.constant 0 : index
    %1 = vector.load %arg2[%c0_1, %c0_2] : memref<32x32xf32, #tpu.memory_space<vmem>>, vector<32x32xf32>
    %cst = arith.constant dense<0.000000e+00> : vector<32x256xf32>
    %2 = tpu.matmul %1, %0, %cst {dimension_numbers = #tpu.dot_dimension_numbers<[1], [1], [0], [0], [0, 0, 1, 0], [], []>} : vector<32x32xf32>, vector<256x32xf32>, vector<32x256xf32> -> vector<32x256xf32>
    %c0_3 = arith.constant 0 : index
    %c0_4 = arith.constant 0 : index
    %3 = vector.load %arg3[%c0_3, %c0_4] : memref<32x1xf32, #tpu.memory_space<vmem>>, vector<32x1xf32>
    %4 = vector.broadcast %3 : vector<32x1xf32> to vector<32x256xf32>
    %5 = arith.addf %2, %4 : vector<32x256xf32>
    %6 = math.tanh %5 : vector<32x256xf32>
    %c0_5 = arith.constant 0 : index
    %c0_6 = arith.constant 0 : index
    %7 = vector.load %arg4[%c0_5, %c0_6] : memref<8x32xf32, #tpu.memory_space<vmem>>, vector<8x32xf32>
    %cst_7 = arith.constant dense<0.000000e+00> : vector<8x256xf32>
    %8 = tpu.matmul %7, %6, %cst_7 {dimension_numbers = #tpu.dot_dimension_numbers<[1], [0], [0], [1], [0, 0, 1, 1], [], []>} : vector<8x32xf32>, vector<32x256xf32>, vector<8x256xf32> -> vector<8x256xf32>
    %c0_8 = arith.constant 0 : index
    %c0_9 = arith.constant 0 : index
    %9 = vector.load %arg5[%c0_8, %c0_9] : memref<8x1xf32, #tpu.memory_space<vmem>>, vector<8x1xf32>
    %10 = vector.broadcast %9 : vector<8x1xf32> to vector<8x256xf32>
    %11 = arith.addf %8, %10 : vector<8x256xf32>
    %12 = arith.mulf %11, %11 : vector<8x256xf32>
    %cst_10 = arith.constant dense<0.000000e+00> : vector<256xf32>
    %13 = vector.multi_reduction <add>, %12, %cst_10 [0] : vector<8x256xf32> to vector<256xf32>
    %14 = vector.shape_cast %13 : vector<256xf32> to vector<1x256xf32>
    %c0_11 = arith.constant 0 : index
    %c0_12 = arith.constant 0 : index
    %15 = vector.load %arg6[%c0_11, %c0_12] : memref<1x256xf32, #tpu.memory_space<vmem>>, vector<1x256xf32>
    tpu.vector_store %arg6[%c0_11, %c0_12], %14 {strides = array<i32>} : memref<1x256xf32, #tpu.memory_space<vmem>>, vector<1x256xf32>,
    return
  }
  func.func @transform_0(%arg0: i32) -> (i32, i32) {
    %c0_i32 = arith.constant 0 : i32
    %c0_i32_0 = arith.constant 0 : i32
    return %arg0, %c0_i32 : i32, i32
  }
  func.func @transform_1(%arg0: i32) -> (i32, i32) {
    %c0_i32 = arith.constant 0 : i32
    %c0_i32_0 = arith.constant 0 : i32
    %c0_i32_1 = arith.constant 0 : i32
    return %c0_i32, %c0_i32_0 : i32, i32
  }
  func.func @transform_2(%arg0: i32) -> (i32, i32) {
    %c0_i32 = arith.constant 0 : i32
    %c0_i32_0 = arith.constant 0 : i32
    %c0_i32_1 = arith.constant 0 : i32
    return %c0_i32, %c0_i32_0 : i32, i32
  }
  func.func @transform_3(%arg0: i32) -> (i32, i32) {
    %c0_i32 = arith.constant 0 : i32
    %c0_i32_0 = arith.constant 0 : i32
    %c0_i32_1 = arith.constant 0 : i32
    return %c0_i32, %c0_i32_0 : i32, i32
  }
  func.func @transform_4(%arg0: i32) -> (i32, i32) {
    %c0_i32 = arith.constant 0 : i32
    %c0_i32_0 = arith.constant 0 : i32
    %c0_i32_1 = arith.constant 0 : i32
    return %c0_i32, %c0_i32_0 : i32, i32
  }
  func.func @transform_5(%arg0: i32) -> (i32, i32) {
    %c0_i32 = arith.constant 0 : i32
    %c0_i32_0 = arith.constant 0 : i32
    return %c0_i32, %arg0 : i32, i32
  }
}

</mosaic_0001>

<bundles_post_ra>
// kernel: sub.1
= control target key start
LH: loop header
LB: loop body
LE: loop exit
PB: predicated region body
PF: predicated region fallthrough
CT: control target
= control target key end

     0   :  { %s34_s0 = inlined_call_operand.vmem [shape: f32[32], index: 0, kind: input, shape index: {}]   ;;  %s35_s1 = inlined_call_operand.vmem [shape: f32[32], index: 1, kind: input, shape index: {}]   ;;  %s36_s2 = inlined_call_operand.vmem [shape: f32[32], index: 2, kind: output, shape index: {}]  }
   0x1   :  { %v3_v0 = vld [vmem:[%s34_s0] sm:$0x1] }
   0x2   :  { %v4_v1 = vld [vmem:[%s35_s1] sm:$0x1] }
   0x3   :  { %v7_v2 = vsub.f32 %v3_v0, %v4_v1 }
   0x5   :  { %9 = vst [vmem:[%s36_s2] sm:$0x1] %v7_v2 }

// kernel: reconf_flow_forward.1
= control target key start
LH: loop header
LB: loop body
LE: loop exit
PB: predicated region body
PF: predicated region fallthrough
CT: control target
= control target key end

     0   :  { %vm81_vm0 = vcmask 261120   ;;  %v598_v7 = vmov 0   ;;  %s817_s0 = inlined_call_operand.vmem [shape: f32[256,32], index: 0, kind: input, shape index: {}]   ;;  %s818_s1 = inlined_call_operand.vmem [shape: f32[32,32], index: 1, kind: input, shape index: {}]   ;;  %s819_s2 = inlined_call_operand.vmem [shape: f32[32,1], index: 2, kind: input, shape index: {}]   ;;  %s820_s3 = inlined_call_operand.vmem [shape: f32[8,32], index: 3, kind: input, shape index: {}]   ;;  %s821_s4 = inlined_call_operand.vmem [shape: f32[8,1], index: 4, kind: input, shape index: {}]   ;;  %s822_s5 = inlined_call_operand.hbm [shape: f32[1,256], index: 5, kind: output, shape index: {}]  }
   0x1   :  { %v37_v0 = vld [vmem:[%s817_s0 + $0x80] sm:$0xff]  ;;  %v38_v1 = vld [vmem:[%s817_s0 + $0x88] sm:$0xff]  ;;  %vm643_vm1 = vmpackc.low %vm81_vm0, %vm81_vm0  ;;  %556 = vset.pattern.permute.xlu0 %v598_v7  ;;  %557 = vset.pattern.permute.xlu1 %v598_v7 }
   0x2   :  { %v21_v2 = vld [vmem:[%s817_s0] sm:$0xff]  ;;  %v496_v3 = vpack.c.bf16 %v38_v1, %v37_v0  ;;  %v22_v5 = vld [vmem:[%s817_s0 + $0x8] sm:$0xff]  ;;  %v39_v6 = vld [vmem:[%s817_s0 + $0x90] sm:$0xff] }
   0x3   :  { %v499_v8 = vpack.c.bf16 %v22_v5, %v21_v2  ;;  %v40_v9 = vld [vmem:[%s817_s0 + $0x98] sm:$0xff]  ;;  %v23_v11 = vld [vmem:[%s817_s0 + $0x10] sm:$0xff]  ;;  %v41_v13 = vld [vmem:[%s817_s0 + $0xa0] sm:$0xff] }
   0x4   :  { %498 = vmatprep.subr.msk.bf16.mxu0 %vm643_vm1, %v496_v3  ;;  %v502_v10 = vpack.c.bf16 %v40_v9, %v39_v6  ;;  %v24_v12 = vld [vmem:[%s817_s0 + $0x18] sm:$0xff]  ;;  %v42_v14 = vld [vmem:[%s817_s0 + $0xa8] sm:$0xff]  ;;  %v53_v17 = vld [vmem:[%s818_s1] sm:$0xff] }
   0x5   :  { %501 = vmatpush3.bf16.xpose.msk.msra.mxu0 %vm643_vm1, %v499_v8  ;;  %v505_v15 = vpack.c.bf16 %v24_v12, %v23_v11  ;;  %v508_v16 = vpack.c.bf16 %v42_v14, %v41_v13  ;;  %v25_v18 = vld [vmem:[%s817_s0 + $0x20] sm:$0xff]  ;;  %488 = vmatprep.mubr.msk.f32.mxu0 %vm81_vm0, %v53_v17  ;;  %v26_v20 = vld [vmem:[%s817_s0 + $0x28] sm:$0xff]  ;;  %v43_v21 = vld [vmem:[%s817_s0 + $0xb0] sm:$0xff] }
   0x6   :  { %504 = vmatprep.subr.msk.bf16.mxu0 %vm643_vm1, %v502_v10  ;;  %v57_v19 = vld [vmem:[%s819_s2] sm:$0xff]  ;;  %v59_v22 = vld [vmem:[%s819_s2 + $0x10] sm:$0xff]  ;;  %v44_v23 = vld [vmem:[%s817_s0 + $0xb8] sm:$0xff] }
   0x7   :  { %63 = vperm.xlu0 %556, %v57_v19   ;;  %v58_v24 = vld [vmem:[%s819_s2 + $0x8] sm:$0xff]  ;;  %73 = vperm.xlu1 %557, %v59_v22  }
   0xd   :  { %507 = vmatpush3.bf16.xpose.msk.msra.mxu0 %vm643_vm1, %v505_v15 }
   0xe   :  { %510 = vmatprep.subr.msk.bf16.mxu0 %vm643_vm1, %v508_v16 }
   0xf   :  { %10 = vsyncpa [#allocation3], 0  ;;  %v60_v25 = vld [vmem:[%s819_s2 + $0x18] sm:$0xff]  ;;  %v511_v26 = vpack.c.bf16 %v26_v20, %v25_v18  ;;  %v514_v27 = vpack.c.bf16 %v44_v23, %v43_v21  ;;  %68 = vperm.xlu0 %556, %v58_v24   ;;  %v288_v28 = vld [vmem:[%s821_s4] sm:$0xff]  ;;  %v599_v59 = vmov 0.0  }
  0x10   :  { %78 = vperm.xlu1 %557, %v60_v25   ;;  %v27_v29 = vld [vmem:[%s817_s0 + $0x30] sm:$0xff]  ;;  %v28_v30 = vld [vmem:[%s817_s0 + $0x38] sm:$0xff]  ;;  %v45_v31 = vld [vmem:[%s817_s0 + $0xc0] sm:$0xff]  ;;  %361 = vmatprep.mubr.f32.mxu1 %v599_v59 }
  0x11   :  { %v46_v32 = vld [vmem:[%s817_s0 + $0xc8] sm:$0xff]  ;;  %v517_v33 = vpack.c.bf16 %v28_v30, %v27_v29  ;;  %v29_v35 = vld [vmem:[%s817_s0 + $0x40] sm:$0xff]  ;;  %v47_v37 = vld [vmem:[%s817_s0 + $0xd0] sm:$0xff] }
  0x12   :  { %v520_v34 = vpack.c.bf16 %v46_v32, %v45_v31  ;;  %v30_v36 = vld [vmem:[%s817_s0 + $0x48] sm:$0xff]  ;;  %v48_v38 = vld [vmem:[%s817_s0 + $0xd8] sm:$0xff]  ;;  %v31_v41 = vld [vmem:[%s817_s0 + $0x50] sm:$0xff] }
  0x13   :  { %291 = vperm.xlu0 %556, %v288_v28   ;;  %v523_v39 = vpack.c.bf16 %v30_v36, %v29_v35  ;;  %v526_v40 = vpack.c.bf16 %v48_v38, %v47_v37  ;;  %v32_v42 = vld [vmem:[%s817_s0 + $0x58] sm:$0xff]  ;;  %v49_v43 = vld [vmem:[%s817_s0 + $0xe0] sm:$0xff]  ;;  %v50_v44 = vld [vmem:[%s817_s0 + $0xe8] sm:$0xff] }
  0x14   :  { %v529_v45 = vpack.c.bf16 %v32_v42, %v31_v41  ;;  %v532_v46 = vpack.c.bf16 %v50_v44, %v49_v43  ;;  %v33_v47 = vld [vmem:[%s817_s0 + $0x60] sm:$0xff]  ;;  %v34_v48 = vld [vmem:[%s817_s0 + $0x68] sm:$0xff]  ;;  %v51_v49 = vld [vmem:[%s817_s0 + $0xf0] sm:$0xff]  ;;  %v388_v42 = vlaneseq }
  0x15   :  { %513 = vmatpush3.bf16.xpose.msk.msra.mxu0 %vm643_vm1, %v511_v26  ;;  %v52_v50 = vld [vmem:[%s817_s0 + $0xf8] sm:$0xff]  ;;  %v535_v51 = vpack.c.bf16 %v34_v48, %v33_v47  ;;  %v35_v53 = vld [vmem:[%s817_s0 + $0x70] sm:$0xff]  ;;  %v54_v56 = vld [vmem:[%s818_s1 + $0x8] sm:$0xff] }
  0x16   :  { %516 = vmatprep.subr.msk.bf16.mxu0 %vm643_vm1, %v514_v27  ;;  %v538_v52 = vpack.c.bf16 %v52_v50, %v51_v49  ;;  %v36_v54 = vld [vmem:[%s817_s0 + $0x78] sm:$0xff]  ;;  %v55_v57 = vld [vmem:[%s818_s1 + $0x10] sm:$0xff]  ;;  %v287_v28 = vld [vmem:[%s820_s3] sm:$0xff]  ;;  %v389_v48 = vshrl.u32 %v388_v42, 7  ;;  %s601_s3 = smov [#allocation2]   ;;  %vm402_vm2 = vcmp.lt.s32.totalorder %v388_v42, 256 }
  0x17   :  { %v541_v55 = vpack.c.bf16 %v36_v54, %v35_v53  ;;  %v56_v58 = vld [vmem:[%s818_s1 + $0x18] sm:$0xff]  ;;  %s411_s21 = sshll.u32 %s601_s3, 4  ;;  %s412_s21 = int_to_ptr.vmem [resolvable:$true] %s411_s21 }
  0x18   :  { %s574_s22 = scalar_lea.vmem %s412_s21, 32  ;;  %p579_p1 = scmp.lt.s32.totalorder %s412_s21, %s412_s21 }
  0x19   :  { %p575_p0 = scmp.ne.s32.totalorder %s412_s21, %s574_s22  ;;  %p580_p2 = scmp.lt.s32.totalorder %s574_s22, %s574_s22 }
  0x1b   :  { %p581_p3 = por %p580_p2, %p579_p1 }
  0x1d   :  { %519 = vmatpush3.bf16.xpose.msk.msra.mxu0 %vm643_vm1, %v517_v33  ;;  %p582_p4 = pnand %p581_p3, %p575_p0 }
  0x1e   :  { %522 = vmatprep.subr.msk.bf16.mxu0 %vm643_vm1, %v520_v34 }
  0x25   :  { %525 = vmatpush3.bf16.xpose.msk.msra.mxu0 %vm643_vm1, %v523_v39 }
  0x26   :  { %528 = vmatprep.subr.msk.bf16.mxu0 %vm643_vm1, %v526_v40  ;;  %v600_v40 = vmov 1966171168  }
  0x27   :  { %v386_v41 = vunpack.c.l.s4 %v600_v40 }
  0x29   :  { %v387_v47 = vunpack.c.0.s8 %v386_v41 }
  0x2b   :  { %v390_v53 = vsub.s32 %v387_v47, %v389_v48 }
  0x2d   :  { %531 = vmatpush3.bf16.xpose.msk.msra.mxu0 %vm643_vm1, %v529_v45 }
  0x2e   :  { %534 = vmatprep.subr.msk.bf16.mxu0 %vm643_vm1, %v532_v46 }
  0x35   :  { %537 = vmatpush3.bf16.xpose.msk.msra.mxu0 %vm643_vm1, %v535_v51 }
  0x36   :  { %540 = vmatprep.subr.msk.bf16.mxu0 %vm643_vm1, %v538_v52 }
  0x3d   :  { %543 = vmatpush3.bf16.xpose.msk.msra.mxu0 %vm643_vm1, %v541_v55 }
  0x44   :  { %489 = vmatmul.mubr.msk.f32.vlgmr.msra.gmra.mrb[0].mxu0 %vm81_vm0, %v53_v17 }
  0x45   :  { %490 = vmatprep.mubr.msk.f32.mxu0 %vm81_vm0, %v54_v56 }
  0x48   :  { %491 = vmatmul.mubr.msk.f32.gmra.mrb[2].mxu0 %vm81_vm0, %v54_v56 }
  0x49   :  { %492 = vmatprep.mubr.msk.f32.mxu0 %vm81_vm0, %v55_v57 }
  0x4c   :  { %493 = vmatmul.mubr.msk.f32.gmra.mrb[4].mxu0 %vm81_vm0, %v55_v57 }
  0x4d   :  { %494 = vmatprep.mubr.msk.f32.mxu0 %vm81_vm0, %v56_v58 }
  0x50   :  { %495 = vmatmul.mubr.msk.f32.gmra.mrb[6].mxu0 %vm81_vm0, %v56_v58 }
  0x86   :  { %v64_v60 = vpop.permute.xlu0 %63  ;;  %v74_v5 = vpop.permute.xlu1 %73 }
  0x8e   :  { %v69_v1 = vpop.permute.xlu0 %68 }
  0x8f   :  { %v79_v11 = vpop.permute.xlu1 %78 }
  0x92   :  { %v292_v29 = vpop.permute.xlu0 %291 }
 0x117   :  { %v256_v61 = vpop.f32.mrb[0].mxu0 }
 0x118   :  { %v257_v62 = vadd.f32 %v256_v61, %v64_v60  ;;  %v258_v63 = vpop.f32.mrb[1].mxu0 }
 0x119   :  { %v259_v0 = vadd.f32 %v258_v63, %v64_v60 }
 0x11a   :  { %558 = vtanh.f32 %v257_v62 }
 0x11b   :  { %v262_v2 = vpop.f32.mrb[2].mxu0  ;;  %560 = vtanh.f32 %v259_v0 }
 0x11c   :  { %v263_v3 = vadd.f32 %v262_v2, %v69_v1  ;;  %v264_v4 = vpop.f32.mrb[3].mxu0 }
 0x11d   :  { %v265_v6 = vadd.f32 %v264_v4, %v69_v1 }
 0x11e   :  { %562 = vtanh.f32 %v263_v3 }
 0x11f   :  { %564 = vtanh.f32 %v265_v6  ;;  %v268_v7 = vpop.f32.mrb[4].mxu0 }
 0x120   :  { %v269_v8 = vadd.f32 %v268_v7, %v74_v5  ;;  %v270_v9 = vpop.f32.mrb[5].mxu0 }
 0x121   :  { %v271_v10 = vadd.f32 %v270_v9, %v74_v5 }
 0x122   :  { %566 = vtanh.f32 %v269_v8 }
 0x123   :  { %v274_v12 = vpop.f32.mrb[6].mxu0  ;;  %568 = vtanh.f32 %v271_v10 }
 0x124   :  { %v275_v13 = vadd.f32 %v274_v12, %v79_v11  ;;  %v276_v14 = vpop.f32.mrb[7].mxu0  ;;  %v559_v16 = vpop.eup %558 }
 0x125   :  { %v277_v15 = vadd.f32 %v276_v14, %v79_v11  ;;  %v561_v17 = vpop.eup %560 }
 0x126   :  { %570 = vtanh.f32 %v275_v13 }
 0x127   :  { %572 = vtanh.f32 %v277_v15 }
 0x128   :  { %v563_v18 = vpop.eup %562 }
 0x129   :  { %v565_v19 = vpop.eup %564  ;;  %v546_v20 = vpack.c.bf16 %v563_v18, %v559_v16 }
 0x12a   :  { %v544_v21 = vpack.c.bf16 %v565_v19, %v561_v17 }
 0x12c   :  { %545 = vmatprep.subr.bf16.mxu1 %v544_v21  ;;  %v567_v22 = vpop.eup %566 }
 0x12d   :  { %547 = vmatpush1.bf16.msra.mxu1 %v546_v20  ;;  %v569_v23 = vpop.eup %568 }
 0x130   :  { %v571_v24 = vpop.eup %570 }
 0x131   :  { %v573_v25 = vpop.eup %572  ;;  %v550_v26 = vpack.c.bf16 %v571_v24, %v567_v22 }
 0x132   :  { %v548_v27 = vpack.c.bf16 %v573_v25, %v569_v23 }
 0x134   :  { %549 = vmatprep.subr.bf16.mxu1 %v548_v27 }
 0x135   :  { %551 = vmatpush1.bf16.msra.mxu1 %v550_v26 }
 0x138   :  { %455 = vmatmul.mubr.msk.f32.vlgmr.msra.gmra.mrb[0].mxu1 %vm81_vm0, %v287_v28 }
 0x20b   :  { %v363_v30 = vpop.f32.mrb[0].mxu1 }
 0x20c   :  { %v364_v31 = vadd.f32 %v363_v30, %v292_v29  ;;  %v365_v32 = vpop.f32.mrb[1].mxu1 }
 0x20d   :  { %v366_v33 = vadd.f32 %v365_v32, %v292_v29 }
 0x20e   :  { %v368_v34 = vmul.f32 %v364_v31, %v364_v31 }
 0x20f   :  { %v369_v35 = vmul.f32 %v366_v33, %v366_v33 }
 0x210   :  { %v370_v36 = vrot.slane %v368_v34, 4 }
 0x211   :  { %v376_v37 = vrot.slane %v369_v35, 4 }
 0x212   :  { %v371_v38 = vadd.f32 %v370_v36, %v368_v34 }
 0x213   :  { %v377_v39 = vadd.f32 %v376_v37, %v369_v35 }
 0x214   :  { %v372_v43 = vrot.slane %v371_v38, 2 }
 0x215   :  { %v378_v44 = vrot.slane %v377_v39, 2 }
 0x216   :  { %v373_v45 = vadd.f32 %v372_v43, %v371_v38 }
 0x217   :  { %v379_v46 = vadd.f32 %v378_v44, %v377_v39 }
 0x218   :  { %v374_v49 = vrot.slane %v373_v45, 1 }
 0x219   :  { %v380_v50 = vrot.slane %v379_v46, 1 }
 0x21a   :  { %v375_v51 = vadd.f32 %v374_v49, %v373_v45 }
 0x21b   :  { %v381_v52 = vadd.f32 %v380_v50, %v379_v46 }
 0x21d   :  { %v384_v54 = vcombine.low %v375_v51, %v381_v52 }
 0x21f   :  { %v391_v55 = vrot.slane %v384_v54, %v390_v53 }
 0x221   :  { %v398_v56 = vrot.slane %v391_v55, %v390_v53 }
 0x223   :  { %404 = vst.msk [vmem:[#allocation2] sm:$0x3] %vm402_vm2, %v398_v56 }
 0x224   :  { %585 = shalt.err (!%p582_p4)
}
 0x225   :  { %s586_s25 = scalar_lea.hbm %s822_s5, 32 }
 0x226   :  { %p587_p5 = scmp.ne.s32.totalorder %s822_s5, %s586_s25  ;;  %p590_p6 = scmp.lt.u32.totalorder %s586_s25, %s822_s5 }
 0x228   :  { %p592_p7 = pnand %p590_p6, %p587_p5 }
 0x22a   :  { %595 = shalt.err (!%p592_p7)
}
 0x22b   :  { %414 = dma.vmem_to_hbm [thread:$0]  %s412_s21, 32, %s822_s5, [#allocation3]  }
 0x22c   :  { %596 = dma.done.wait [#allocation3], 32  }
 0x22d   :  { %597 = vsyncadd [#allocation3], 4294967264 }
 0x22e   :  { %418 = vsyncpa [#allocation3], 1 }

</bundles_post_ra>
